<compile_context>
chip_gen: v5e
topology: v5e:2x2
jax: 0.10.0
libtpu: 0.0.40
codegen_flags: <defaults>
</compile_context>

<pallas_src>
import jax
import jax.numpy as jnp
from jax.experimental import pallas as pl
from jax.experimental.pallas import tpu as pltpu

_MIB = 1 << 20


def _round_up(v, m):
    return (v + m - 1) // m * m


# ---------------------------------------------------------------------------
# Kernel
# ---------------------------------------------------------------------------
def _two_layer_kernel(x_ref, w1_ref, b1_ref, w2_ref, b2_ref, o_ref):
    # x_ref:  (TILE_N, D_in)    w1_ref: (D_in, H_p)    b1_ref: (1, H_p)
    # w2_ref: (H_p, D_out_p)    b2_ref: (1, D_out_p)   o_ref:  (TILE_N, D_out_p)
    #
    # Matmuls use the weights' dtype (bf16 by default) with f32 MXU accumulation;
    # bias adds and log-softmax stay in f32.
    x = x_ref[...].astype(w1_ref.dtype)

    # linear1 + clamp(min=0) (ReLU)
    h = jnp.dot(x, w1_ref[...], preferred_element_type=jnp.float32) + b1_ref[...]
    h = jnp.maximum(h, 0.0)

    # linear2 (padded logit lanes already carry -1e30 via b2 -> no in-kernel mask)
    y = jnp.dot(h.astype(w2_ref.dtype), w2_ref[...],
                preferred_element_type=jnp.float32) + b2_ref[...]

    # Numerically stable LogSoftmax along dim=1 (features), f32.
    m = jnp.max(y, axis=1, keepdims=True)
    z = y - m
    lse = jnp.log(jnp.sum(jnp.exp(z), axis=1, keepdims=True))
    o_ref[...] = (z - lse).astype(o_ref.dtype)


# ---------------------------------------------------------------------------
# VMEM budgeting + batch-tile selection
# ---------------------------------------------------------------------------
def _kernel_vmem_bytes(tile_n, d_in, h_p, d_out_p, x_bytes, w_bytes, weight_bufs):
    weights = weight_bufs * ((d_in * h_p + h_p * d_out_p) * w_bytes
                             + (h_p + d_out_p) * 4)
    x_bufs = 2 * tile_n * d_in * x_bytes            # double-buffered streamed input
    out_bufs = 2 * tile_n * d_out_p * 4             # double-buffered streamed output
    interm = tile_n * h_p * (4 + w_bytes) + 2 * tile_n * d_out_p * 4
    return weights + x_bufs + out_bufs + interm


def _pick_tile_n(n, d_in, h_p, d_out_p, x_bytes, w_bytes):
    if n <= 128:
        return _round_up(max(n, 8), 8)              # single small tile
    budget = 40 * _MIB                              # safe on every TPU generation
    best = None
    for t in (512, 256, 128):
        n_p = _round_up(n, t)
        if n_p // t < 2:                            # keep >= 2 tiles (v7x has 2 TCs)
            continue
        if _kernel_vmem_bytes(t, d_in, h_p, d_out_p, x_bytes, w_bytes, 2) > budget:
            continue
        key = (n_p - n, -t)                         # least padding, then biggest tile
        if best is None or key < best[0]:
            best = (key, t)
    return best[1] if best is not None else 128


# ---------------------------------------------------------------------------
# Parameter prep (run ONCE per model) + forward
# ---------------------------------------------------------------------------
def prepare_params(w1, b1, w2, b2, *, matmul_dtype=jnp.bfloat16):
    """One-time parameter prep: transpose, pad H/D_out to 128-lane multiples, cast.

    w1: (H, D_in)  b1: (H,)  w2: (D_out, H)  b2: (D_out,)
    """
    H, D_in = w1.shape
    D_out, H2 = w2.shape
    assert H2 == H and b1.shape == (H,) and b2.shape == (D_out,)
    h_p = _round_up(H, 128)
    d_out_p = _round_up(D_out, 128)

    w1_t = jnp.pad(jnp.asarray(w1, jnp.float32).T,
                   ((0, 0), (0, h_p - H))).astype(matmul_dtype)
    b1_p = jnp.pad(jnp.asarray(b1, jnp.float32), (0, h_p - H)).reshape(1, h_p)
    w2_t = jnp.pad(jnp.asarray(w2, jnp.float32).T,
                   ((0, h_p - H), (0, d_out_p - D_out))).astype(matmul_dtype)
    # Padded logit lanes equal their bias (zero w2 columns); preloading -1e30 there
    # removes them from the softmax normalization with no in-kernel mask.
    b2_p = jnp.pad(jnp.asarray(b2, jnp.float32), (0, d_out_p - D_out),
                   constant_values=-1e30).reshape(1, d_out_p)

    return {"w1_t": w1_t, "b1": b1_p, "w2_t": w2_t, "b2": b2_p,
            "D_in": D_in, "H": H, "D_out": D_out}


def two_layer_net_apply(params, x):
    """log_softmax(relu(x @ w1.T + b1) @ w2.T + b2, axis=1); x: (N, D_in)."""
    w1_t, b1_p = params["w1_t"], params["b1"]
    w2_t, b2_p = params["w2_t"], params["b2"]
    D_in, D_out = params["D_in"], params["D_out"]
    N, d_in_x = x.shape
    assert d_in_x == D_in
    d_in = D_in                                    # x streamed unpadded in features
    h_p = w1_t.shape[1]
    d_out_p = w2_t.shape[1]

    x_bytes = jnp.dtype(x.dtype).itemsize
    w_bytes = jnp.dtype(w1_t.dtype).itemsize

    tile_n = _pick_tile_n(N, d_in, h_p, d_out_p, x_bytes, w_bytes)
    n_p = _round_up(N, tile_n)
    x_p = jnp.pad(x, ((0, n_p - N), (0, 0))) if n_p != N else x
    grid = (n_p // tile_n,)

    # Scoped-VMEM budget from the real footprint (conservatively assume the
    # double-buffered weight fallback); clamp to 64 MiB so it is valid on v7x.
    need = _kernel_vmem_bytes(tile_n, d_in, h_p, d_out_p, x_bytes, w_bytes, 2)
    vmem_limit = int(min(max(need * 5 // 4 + 2 * _MIB, 32 * _MIB), 64 * _MIB))
    # TODO(synk): if the (bf16) weights alone exceed ~48 MiB (very large H/D_out),
    # add a contraction-tiling grid axis instead of keeping whole matrices resident.

    out_shape = jax.ShapeDtypeStruct((n_p, d_out_p), x.dtype)
    compiler_params = pltpu.CompilerParams(
        dimension_semantics=("parallel",), vmem_limit_bytes=vmem_limit)

    def build(weight_mode):
        def wspec(shape):
            if weight_mode is None:
                return pl.BlockSpec(shape, lambda i: (0, 0))
            return pl.BlockSpec(shape, lambda i: (0, 0), pipeline_mode=weight_mode)

        return pl.pallas_call(
            _two_layer_kernel,
            out_shape=out_shape,
            grid=grid,
            in_specs=[
                pl.BlockSpec((tile_n, d_in), lambda i: (i, 0)),   # x: streamed
                wspec((d_in, h_p)),                               # w1: VMEM-resident
                wspec((1, h_p)),                                  # b1: VMEM-resident
                wspec((h_p, d_out_p)),                            # w2: VMEM-resident
                wspec((1, d_out_p)),                              # b2: VMEM-resident
            ],
            out_specs=pl.BlockSpec((tile_n, d_out_p), lambda i: (i, 0)),
            compiler_params=compiler_params,
        )

    try:
        # Constant-index-map weights only need a single VMEM buffer.
        out_p = build(pl.Buffered(1))(x_p, w1_t, b1_p, w2_t, b2_p)
    except Exception:
        # Fallback if this Pallas version rejects pipeline_mode on pallas_call specs.
        out_p = build(None)(x_p, w1_t, b1_p, w2_t, b2_p)

    return out_p[:N, :D_out]


def two_layer_net(x, w1, b1, w2, b2, *, matmul_dtype=jnp.bfloat16):
    """Convenience one-shot wrapper (prefer prepare_params + two_layer_net_apply)."""
    return two_layer_net_apply(
        prepare_params(w1, b1, w2, b2, matmul_dtype=matmul_dtype), x)


# ---------------------------------------------------------------------------
# Reference + demo
# ---------------------------------------------------------------------------
def _init_linear(key, out_features, in_features, dtype=jnp.float32):
    """PyTorch nn.Linear default init: U(-1/sqrt(fan_in), 1/sqrt(fan_in))."""
    kw, kb = jax.random.split(key)
    bound = 1.0 / jnp.sqrt(jnp.float32(in_features))
    w = jax.random.uniform(kw, (out_features, in_features), dtype,
                           minval=-bound, maxval=bound)
    b = jax.random.uniform(kb, (out_features,), dtype,
                           minval=-bound, maxval=bound)
    return w, b


def _reference(x, w1, b1, w2, b2):
    h = jnp.maximum(x @ w1.T + b1, 0.0)
    y = h @ w2.T + b2
    return jax.nn.log_softmax(y, axis=1)


if __name__ == "__main__":
    D_in, H, D_out = 32, 64, 16
    key = jax.random.PRNGKey(0)
    kx1, kx2, k1, k2 = jax.random.split(key, 4)
    w1, b1 = _init_linear(k1, H, D_in)
    w2, b2 = _init_linear(k2, D_out, H)

    # Prepare parameters ONCE (hoisted out of the per-call forward path).
    params_f32 = prepare_params(w1, b1, w2, b2, matmul_dtype=jnp.float32)  # exactness
    params_bf16 = prepare_params(w1, b1, w2, b2)                           # perf path

    # Case 1: tiny batch (single 8-row tile).  Case 2: multi-tile batch with a
    # remainder (exercises tile selection, batch padding, padded-lane masking).
    x_small = jax.random.normal(kx1, (8, D_in), jnp.float32)
    x_big = jax.random.normal(kx2, (300, D_in), jnp.float32)

    for x in (x_small, x_big):
        ref = _reference(x, w1, b1, w2, b2)

        out32 = jax.block_until_ready(two_layer_net_apply(params_f32, x))
        assert out32.shape == ref.shape
        assert jnp.allclose(out32, ref, atol=1e-4, rtol=1e-4)

        out16 = jax.block_until_ready(two_layer_net_apply(params_bf16, x))
        assert out16.shape == ref.shape
        assert jnp.allclose(out16, ref, atol=3e-2, rtol=3e-2)  # bf16-matmul tolerance

    print("KERNEL_OK")
</pallas_src>

<mosaic_0001>
module attributes {stable_mosaic.version = 11 : i64} {
  func.func @_two_layer_kernel(%arg0: i32, %arg1: memref<8x32xf32, #tpu.memory_space<vmem>>, %arg2: memref<32x128xf32, #tpu.memory_space<vmem>>, %arg3: memref<1x128xf32, #tpu.memory_space<vmem>>, %arg4: memref<128x128xf32, #tpu.memory_space<vmem>>, %arg5: memref<1x128xf32, #tpu.memory_space<vmem>>, %arg6: memref<8x128xf32, #tpu.memory_space<vmem>>) attributes {dimension_semantics = [#tpu.dimension_semantics<parallel>], iteration_bounds = array<i64: 1>, scalar_prefetch = 0 : i64, scratch_operands = 0 : i64, tpu.core_type = #tpu.core_type<tc>, window_params = [{transform_indices = @transform_0, window_bounds = array<i64: 8, 32>}, {pipeline_mode = #tpu.pipeline_mode<synchronous>, transform_indices = @transform_1, window_bounds = array<i64: 32, 128>}, {pipeline_mode = #tpu.pipeline_mode<synchronous>, transform_indices = @transform_2, window_bounds = array<i64: 1, 128>}, {pipeline_mode = #tpu.pipeline_mode<synchronous>, transform_indices = @transform_3, window_bounds = array<i64: 128, 128>}, {pipeline_mode = #tpu.pipeline_mode<synchronous>, transform_indices = @transform_4, window_bounds = array<i64: 1, 128>}, {transform_indices = @transform_5, window_bounds = array<i64: 8, 128>}]} {
    %c0 = arith.constant 0 : index
    %c0_0 = arith.constant 0 : index
    %0 = vector.load %arg1[%c0, %c0_0] : memref<8x32xf32, #tpu.memory_space<vmem>>, vector<8x32xf32>
    %c0_1 = arith.constant 0 : index
    %c0_2 = arith.constant 0 : index
    %1 = vector.load %arg2[%c0_1, %c0_2] : memref<32x128xf32, #tpu.memory_space<vmem>>, vector<32x128xf32>
    %cst = arith.constant dense<0.000000e+00> : vector<8x128xf32>
    %2 = tpu.matmul %0, %1, %cst {dimension_numbers = #tpu.dot_dimension_numbers<[1], [0], [0], [1], [0, 0, 1, 1], [], []>} : vector<8x32xf32>, vector<32x128xf32>, vector<8x128xf32> -> vector<8x128xf32>
    %c0_3 = arith.constant 0 : index
    %c0_4 = arith.constant 0 : index
    %3 = vector.load %arg3[%c0_3, %c0_4] : memref<1x128xf32, #tpu.memory_space<vmem>>, vector<1x128xf32>
    %4 = vector.broadcast %3 : vector<1x128xf32> to vector<8x128xf32>
    %5 = arith.addf %2, %4 : vector<8x128xf32>
    %cst_5 = arith.constant 0.000000e+00 : f32
    %6 = vector.broadcast %cst_5 : f32 to vector<8x128xf32>
    %7 = arith.maximumf %5, %6 : vector<8x128xf32>
    %c0_6 = arith.constant 0 : index
    %c0_7 = arith.constant 0 : index
    %8 = vector.load %arg4[%c0_6, %c0_7] : memref<128x128xf32, #tpu.memory_space<vmem>>, vector<128x128xf32>
    %cst_8 = arith.constant dense<0.000000e+00> : vector<8x128xf32>
    %9 = tpu.matmul %7, %8, %cst_8 {dimension_numbers = #tpu.dot_dimension_numbers<[1], [0], [0], [1], [0, 0, 1, 1], [], []>} : vector<8x128xf32>, vector<128x128xf32>, vector<8x128xf32> -> vector<8x128xf32>
    %c0_9 = arith.constant 0 : index
    %c0_10 = arith.constant 0 : index
    %10 = vector.load %arg5[%c0_9, %c0_10] : memref<1x128xf32, #tpu.memory_space<vmem>>, vector<1x128xf32>
    %11 = vector.broadcast %10 : vector<1x128xf32> to vector<8x128xf32>
    %12 = arith.addf %9, %11 : vector<8x128xf32>
    %cst_11 = arith.constant dense<0xFF800000> : vector<8xf32>
    %13 = vector.multi_reduction <maximumf>, %12, %cst_11 [1] : vector<8x128xf32> to vector<8xf32>
    %14 = vector.shape_cast %13 : vector<8xf32> to vector<8x1xf32>
    %15 = vector.broadcast %14 : vector<8x1xf32> to vector<8x128xf32>
    %16 = arith.subf %12, %15 : vector<8x128xf32>
    %17 = math.exp %16 : vector<8x128xf32>
    %cst_12 = arith.constant dense<0.000000e+00> : vector<8xf32>
    %18 = vector.multi_reduction <add>, %17, %cst_12 [1] : vector<8x128xf32> to vector<8xf32>
    %19 = vector.shape_cast %18 : vector<8xf32> to vector<8x1xf32>
    %20 = math.log %19 : vector<8x1xf32>
    %21 = vector.broadcast %20 : vector<8x1xf32> to vector<8x128xf32>
    %22 = arith.subf %16, %21 : vector<8x128xf32>
    %c0_13 = arith.constant 0 : index
    %c0_14 = arith.constant 0 : index
    %23 = vector.load %arg6[%c0_13, %c0_14] : memref<8x128xf32, #tpu.memory_space<vmem>>, vector<8x128xf32>
    tpu.vector_store %arg6[%c0_13, %c0_14], %22 {strides = array<i32>} : memref<8x128xf32, #tpu.memory_space<vmem>>, vector<8x128xf32>,
    return
  }
  func.func @transform_0(%arg0: i32) -> (i32, i32) {
    %c0_i32 = arith.constant 0 : i32
    %c0_i32_0 = arith.constant 0 : i32
    return %arg0, %c0_i32 : i32, i32
  }
  func.func @transform_1(%arg0: i32) -> (i32, i32) {
    %c0_i32 = arith.constant 0 : i32
    %c0_i32_0 = arith.constant 0 : i32
    %c0_i32_1 = arith.constant 0 : i32
    return %c0_i32, %c0_i32_0 : i32, i32
  }
  func.func @transform_2(%arg0: i32) -> (i32, i32) {
    %c0_i32 = arith.constant 0 : i32
    %c0_i32_0 = arith.constant 0 : i32
    %c0_i32_1 = arith.constant 0 : i32
    return %c0_i32, %c0_i32_0 : i32, i32
  }
  func.func @transform_3(%arg0: i32) -> (i32, i32) {
    %c0_i32 = arith.constant 0 : i32
    %c0_i32_0 = arith.constant 0 : i32
    %c0_i32_1 = arith.constant 0 : i32
    return %c0_i32, %c0_i32_0 : i32, i32
  }
  func.func @transform_4(%arg0: i32) -> (i32, i32) {
    %c0_i32 = arith.constant 0 : i32
    %c0_i32_0 = arith.constant 0 : i32
    %c0_i32_1 = arith.constant 0 : i32
    return %c0_i32, %c0_i32_0 : i32, i32
  }
  func.func @transform_5(%arg0: i32) -> (i32, i32) {
    %c0_i32 = arith.constant 0 : i32
    %c0_i32_0 = arith.constant 0 : i32
    return %arg0, %c0_i32 : i32, i32
  }
}

module attributes {stable_mosaic.version = 11 : i64} {
  func.func @_two_layer_kernel(%arg0: i32, %arg1: memref<8x32xf32, #tpu.memory_space<vmem>>, %arg2: memref<32x128xf32, #tpu.memory_space<vmem>>, %arg3: memref<1x128xf32, #tpu.memory_space<vmem>>, %arg4: memref<128x128xf32, #tpu.memory_space<vmem>>, %arg5: memref<1x128xf32, #tpu.memory_space<vmem>>, %arg6: memref<8x128xf32, #tpu.memory_space<vmem>>) attributes {dimension_semantics = [#tpu.dimension_semantics<parallel>], iteration_bounds = array<i64: 1>, scalar_prefetch = 0 : i64, scratch_operands = 0 : i64, tpu.core_type = #tpu.core_type<tc>, window_params = [{transform_indices = @transform_0, window_bounds = array<i64: 8, 32>}, {pipeline_mode = #tpu.pipeline_mode<synchronous>, transform_indices = @transform_1, window_bounds = array<i64: 32, 128>}, {pipeline_mode = #tpu.pipeline_mode<synchronous>, transform_indices = @transform_2, window_bounds = array<i64: 1, 128>}, {pipeline_mode = #tpu.pipeline_mode<synchronous>, transform_indices = @transform_3, window_bounds = array<i64: 128, 128>}, {pipeline_mode = #tpu.pipeline_mode<synchronous>, transform_indices = @transform_4, window_bounds = array<i64: 1, 128>}, {transform_indices = @transform_5, window_bounds = array<i64: 8, 128>}]} {
    %c0 = arith.constant 0 : index
    %c0_0 = arith.constant 0 : index
    %0 = vector.load %arg1[%c0, %c0_0] : memref<8x32xf32, #tpu.memory_space<vmem>>, vector<8x32xf32>
    %c0_1 = arith.constant 0 : index
    %c0_2 = arith.constant 0 : index
    %1 = vector.load %arg2[%c0_1, %c0_2] : memref<32x128xf32, #tpu.memory_space<vmem>>, vector<32x128xf32>
    %cst = arith.constant dense<0.000000e+00> : vector<8x128xf32>
    %2 = tpu.matmul %0, %1, %cst {dimension_numbers = #tpu.dot_dimension_numbers<[1], [0], [0], [1], [0, 0, 1, 1], [], []>} : vector<8x32xf32>, vector<32x128xf32>, vector<8x128xf32> -> vector<8x128xf32>
    %c0_3 = arith.constant 0 : index
    %c0_4 = arith.constant 0 : index
    %3 = vector.load %arg3[%c0_3, %c0_4] : memref<1x128xf32, #tpu.memory_space<vmem>>, vector<1x128xf32>
    %4 = vector.broadcast %3 : vector<1x128xf32> to vector<8x128xf32>
    %5 = arith.addf %2, %4 : vector<8x128xf32>
    %cst_5 = arith.constant 0.000000e+00 : f32
    %6 = vector.broadcast %cst_5 : f32 to vector<8x128xf32>
    %7 = arith.maximumf %5, %6 : vector<8x128xf32>
    %c0_6 = arith.constant 0 : index
    %c0_7 = arith.constant 0 : index
    %8 = vector.load %arg4[%c0_6, %c0_7] : memref<128x128xf32, #tpu.memory_space<vmem>>, vector<128x128xf32>
    %cst_8 = arith.constant dense<0.000000e+00> : vector<8x128xf32>
    %9 = tpu.matmul %7, %8, %cst_8 {dimension_numbers = #tpu.dot_dimension_numbers<[1], [0], [0], [1], [0, 0, 1, 1], [], []>} : vector<8x128xf32>, vector<128x128xf32>, vector<8x128xf32> -> vector<8x128xf32>
    %c0_9 = arith.constant 0 : index
    %c0_10 = arith.constant 0 : index
    %10 = vector.load %arg5[%c0_9, %c0_10] : memref<1x128xf32, #tpu.memory_space<vmem>>, vector<1x128xf32>
    %11 = vector.broadcast %10 : vector<1x128xf32> to vector<8x128xf32>
    %12 = arith.addf %9, %11 : vector<8x128xf32>
    %cst_11 = arith.constant dense<0xFF800000> : vector<8xf32>
    %13 = vector.multi_reduction <maximumf>, %12, %cst_11 [1] : vector<8x128xf32> to vector<8xf32>
    %14 = vector.shape_cast %13 : vector<8xf32> to vector<8x1xf32>
    %15 = vector.broadcast %14 : vector<8x1xf32> to vector<8x128xf32>
    %16 = arith.subf %12, %15 : vector<8x128xf32>
    %17 = math.exp %16 : vector<8x128xf32>
    %cst_12 = arith.constant dense<0.000000e+00> : vector<8xf32>
    %18 = vector.multi_reduction <add>, %17, %cst_12 [1] : vector<8x128xf32> to vector<8xf32>
    %19 = vector.shape_cast %18 : vector<8xf32> to vector<8x1xf32>
    %20 = math.log %19 : vector<8x1xf32>
    %21 = vector.broadcast %20 : vector<8x1xf32> to vector<8x128xf32>
    %22 = arith.subf %16, %21 : vector<8x128xf32>
    %c0_13 = arith.constant 0 : index
    %c0_14 = arith.constant 0 : index
    %23 = vector.load %arg6[%c0_13, %c0_14] : memref<8x128xf32, #tpu.memory_space<vmem>>, vector<8x128xf32>
    tpu.vector_store %arg6[%c0_13, %c0_14], %22 {strides = array<i32>} : memref<8x128xf32, #tpu.memory_space<vmem>>, vector<8x128xf32>,
    return
  }
  func.func @transform_0(%arg0: i32) -> (i32, i32) {
    %c0_i32 = arith.constant 0 : i32
    %c0_i32_0 = arith.constant 0 : i32
    return %arg0, %c0_i32 : i32, i32
  }
  func.func @transform_1(%arg0: i32) -> (i32, i32) {
    %c0_i32 = arith.constant 0 : i32
    %c0_i32_0 = arith.constant 0 : i32
    %c0_i32_1 = arith.constant 0 : i32
    return %c0_i32, %c0_i32_0 : i32, i32
  }
  func.func @transform_2(%arg0: i32) -> (i32, i32) {
    %c0_i32 = arith.constant 0 : i32
    %c0_i32_0 = arith.constant 0 : i32
    %c0_i32_1 = arith.constant 0 : i32
    return %c0_i32, %c0_i32_0 : i32, i32
  }
  func.func @transform_3(%arg0: i32) -> (i32, i32) {
    %c0_i32 = arith.constant 0 : i32
    %c0_i32_0 = arith.constant 0 : i32
    %c0_i32_1 = arith.constant 0 : i32
    return %c0_i32, %c0_i32_0 : i32, i32
  }
  func.func @transform_4(%arg0: i32) -> (i32, i32) {
    %c0_i32 = arith.constant 0 : i32
    %c0_i32_0 = arith.constant 0 : i32
    %c0_i32_1 = arith.constant 0 : i32
    return %c0_i32, %c0_i32_0 : i32, i32
  }
  func.func @transform_5(%arg0: i32) -> (i32, i32) {
    %c0_i32 = arith.constant 0 : i32
    %c0_i32_0 = arith.constant 0 : i32
    return %arg0, %c0_i32 : i32, i32
  }
}

</mosaic_0001>

<bundles_post_ra>
// kernel: tpu_custom_call.1
= control target key start
LH: loop header
LB: loop body
LE: loop exit
PB: predicated region body
PF: predicated region fallthrough
CT: control target
= control target key end

     0   :  { %10 = vsyncpa [#allocation3], 0  ;;  %s338_s0 = inlined_call_operand.hbm [shape: f32[8,32], index: 0, kind: input, shape index: {}]   ;;  %s339_s1 = inlined_call_operand.hbm [shape: f32[32,128], index: 1, kind: input, shape index: {}]   ;;  %s340_s2 = inlined_call_operand.vmem [shape: f32[1,128], index: 2, kind: input, shape index: {}]   ;;  %s341_s3 = inlined_call_operand.hbm [shape: f32[128,128], index: 3, kind: input, shape index: {}]   ;;  %s342_s4 = inlined_call_operand.vmem [shape: f32[1,128], index: 4, kind: input, shape index: {}]   ;;  %s343_s5 = inlined_call_operand.hbm [shape: f32[8,128], index: 5, kind: output, shape index: {}]  }
   0x1   :  { %11 = vsyncpa [#allocation6], 0  ;;  %s28_s20 = sshll.u32 %s339_s1, 4  ;;  %s29_s20 = int_to_ptr.hbm [resolvable:$true] %s28_s20 }
   0x2   :  { %12 = vsyncpa [#allocation4], 0  ;;  %s284_s21 = smov [#allocation5]   ;;  %s18_s25 = sshll.u32 %s338_s0, 4  ;;  %s19_s25 = int_to_ptr.hbm [resolvable:$true] %s18_s25 }
   0x3   :  { %s30_s22 = sshll.u32 %s284_s21, 4  ;;  %s285_s26 = smov 128   ;;  %s31_s22 = int_to_ptr.vmem [resolvable:$true] %s30_s22 }
   0x4   :  { %s286_s27 = smov 8   ;;  %s287_s28 = smov [#allocation2]  }
   0x5   :  { %36 = dma.hbm_to_vmem [thread:$0]  %s29_s20, 512, %s31_s22, [#allocation6], %s285_s26, %s285_s26, %s286_s27  }
   0x6   :  { %s20_s29 = sshll.u32 %s287_s28, 4  ;;  %s43_s7 = sshll.u32 %s341_s3, 4  ;;  %s21_s29 = int_to_ptr.vmem [resolvable:$true] %s20_s29  ;;  %s44_s7 = int_to_ptr.hbm [resolvable:$true] %s43_s7 }
   0x7   :  { %23 = dma.hbm_to_vmem [thread:$0]  %s19_s25, 128, %s21_s29, [#allocation3]  }
   0x8   :  { %s288_s1 = smov [#allocation7]  }
   0x9   :  { %s45_s8 = sshll.u32 %s288_s1, 4  ;;  %s46_s8 = int_to_ptr.vmem [resolvable:$true] %s45_s8 }
   0xa   :  { %51 = dma.hbm_to_vmem [thread:$0]  %s44_s7, 2048, %s46_s8, [#allocation6], %s285_s26, %s285_s26, %s286_s27  }
   0xb   :  { %278 = dma.done.wait [#allocation3], 128  }
   0xc   :  { %279 = vsyncadd [#allocation3], 4294967168 }
   0xd   :  { %280 = dma.done.wait [#allocation6], 2560  }
   0xe   :  { %281 = vsyncadd [#allocation6], 4294964736  ;;  %v70_v0 = vld [vmem:[#allocation5 + $0x18] sm:$0xff]  ;;  %v69_v1 = vld [vmem:[#allocation5 + $0x10] sm:$0xff]  ;;  %vm75_vm0 = vcmask 261120   ;;  %s158_s14 = sshll.u32 %s343_s5, 4  ;;  %s159_s14 = int_to_ptr.hbm [resolvable:$true] %s158_s14 }
   0xf   :  { %91 = vmatpush.msra.mxu0 %v70_v0  ;;  %v115_v2 = vld [vmem:[#allocation7 + $0x78] sm:$0xff]  ;;  %v68_v3 = vld [vmem:[#allocation5 + $0x8] sm:$0xff]  ;;  %v114_v4 = vld [vmem:[#allocation7 + $0x70] sm:$0xff] }
  0x10   :  { %120 = vmatpush.msra.mxu1 %v115_v2  ;;  %v113_v5 = vld [vmem:[#allocation7 + $0x68] sm:$0xff]  ;;  %v67_v6 = vld [vmem:[#allocation5] sm:$0xff]  ;;  %v66_v7 = vld [vmem:[#allocation2] sm:$0xff] }
  0x11   :  { %92 = vmatpush.msra.mxu0 %v69_v1  ;;  %v112_v8 = vld [vmem:[#allocation7 + $0x60] sm:$0xff]  ;;  %v111_v9 = vld [vmem:[#allocation7 + $0x58] sm:$0xff]  ;;  %v110_v10 = vld [vmem:[#allocation7 + $0x50] sm:$0xff] }
  0x12   :  { %121 = vmatpush.msra.mxu1 %v114_v4  ;;  %v109_v11 = vld [vmem:[#allocation7 + $0x48] sm:$0xff]  ;;  %v108_v12 = vld [vmem:[#allocation7 + $0x40] sm:$0xff]  ;;  %v107_v13 = vld [vmem:[#allocation7 + $0x38] sm:$0xff] }
  0x13   :  { %93 = vmatpush.msra.mxu0 %v68_v3  ;;  %v106_v14 = vld [vmem:[#allocation7 + $0x30] sm:$0xff]  ;;  %v105_v15 = vld [vmem:[#allocation7 + $0x28] sm:$0xff]  ;;  %v104_v16 = vld [vmem:[#allocation7 + $0x20] sm:$0xff] }
  0x14   :  { %122 = vmatpush.msra.mxu1 %v113_v5  ;;  %v103_v17 = vld [vmem:[#allocation7 + $0x18] sm:$0xff]  ;;  %v102_v18 = vld [vmem:[#allocation7 + $0x10] sm:$0xff]  ;;  %v101_v19 = vld [vmem:[#allocation7 + $0x8] sm:$0xff] }
  0x15   :  { %94 = vmatpush.msra.mxu0 %v67_v6  ;;  %v100_v20 = vld [vmem:[#allocation7] sm:$0xff]  ;;  %v176_v21 = vld [vmem:[%s340_s2] ss:$0 sm:$0xff]  ;;  %s289_s2 = smov [#allocation8]  }
  0x16   :  { %169 = vmatmul.msk.f32.vlgmr.msra.gmra.mxu0 %vm75_vm0, %v66_v7  ;;  %123 = vmatpush.msra.mxu1 %v112_v8  ;;  %v177_v25 = vld [vmem:[%s342_s4] ss:$0 sm:$0xff]  ;;  %s156_s11 = sshll.u32 %s289_s2, 4  ;;  %s157_s11 = int_to_ptr.vmem [resolvable:$true] %s156_s11 }
  0x18   :  { %124 = vmatpush.msra.mxu1 %v111_v9 }
  0x1a   :  { %125 = vmatpush.msra.mxu1 %v110_v10 }
  0x1c   :  { %126 = vmatpush.msra.mxu1 %v109_v11 }
  0x1e   :  { %127 = vmatpush.msra.mxu1 %v108_v12 }
  0x20   :  { %128 = vmatpush.msra.mxu1 %v107_v13 }
  0x22   :  { %129 = vmatpush.msra.mxu1 %v106_v14 }
  0x24   :  { %130 = vmatpush.msra.mxu1 %v105_v15 }
  0x26   :  { %131 = vmatpush.msra.mxu1 %v104_v16 }
  0x28   :  { %132 = vmatpush.msra.mxu1 %v103_v17 }
  0x2a   :  { %133 = vmatpush.msra.mxu1 %v102_v18 }
  0x2c   :  { %134 = vmatpush.msra.mxu1 %v101_v19 }
  0x2e   :  { %135 = vmatpush.msra.mxu1 %v100_v20 }
  0x93   :  { %v96_v22 = vpop.f32.mrf.mxu0 }
  0x94   :  { %v97_v23 = vadd.f32 %v176_v21, %v96_v22 }
  0x96   :  { %v99_v24 = vmax.f32 %v97_v23, 0.0 }
  0x98   :  { %136 = vmatmul.f32.vlgmr.msra.gmra.mxu1 %v99_v24 }
 0x115   :  { %v137_v26 = vpop.f32.mrf.mxu1 }
 0x116   :  { %v138_v27 = vadd.f32 %v177_v25, %v137_v26 }
 0x118   :  { %140 = vmax.xlane.f32.xlu0 %v138_v27 }
 0x18b   :  { %v141_v28 = vpop.xlane.xlu0 %140 }
 0x18c   :  { %v142_v29 = vsub.f32 %v138_v27, %v141_v28 }
 0x18e   :  { %v143_v30 = vmul.f32 1.442695, %v142_v29 }
 0x190   :  { %178 = vpow2.f32 %v143_v30 }
 0x196   :  { %v179_v31 = vpop.eup %178 }
 0x197   :  { %145 = vadd.xlane.f32.xlu0 %v179_v31 }
 0x20a   :  { %v146_v32 = vpop.xlane.xlu0 %145 }
 0x20b   :  { %180 = vlog2.f32 %v146_v32 }
 0x211   :  { %v181_v33 = vpop.eup %180 }
 0x212   :  { %v148_v34 = vmul.f32 0.6931472, %v181_v33 }
 0x214   :  { %v149_v35 = vsub.f32 %v142_v29, %v148_v34 }
 0x216   :  { %150 = vst [vmem:[#allocation8] sm:$0xff] %v149_v35 }
 0x217   :  { %161 = dma.vmem_to_hbm [thread:$0]  %s157_s11, 128, %s159_s14, [#allocation4]  }
 0x218   :  { %282 = dma.done.wait [#allocation4], 128  }
 0x219   :  { %283 = vsyncadd [#allocation4], 4294967168 }
 0x21a   :  { %166 = vsyncpa [#allocation3], 1 }
 0x21b   :  { %167 = vsyncpa [#allocation6], 1 }
 0x21c   :  { %168 = vsyncpa [#allocation4], 1 }

// kernel: tpu_custom_call.1
= control target key start
LH: loop header
LB: loop body
LE: loop exit
PB: predicated region body
PF: predicated region fallthrough
CT: control target
= control target key end

     0   :  { %10 = vsyncpa [#allocation3], 0  ;;  %s338_s0 = inlined_call_operand.hbm [shape: f32[8,32], index: 0, kind: input, shape index: {}]   ;;  %s339_s1 = inlined_call_operand.hbm [shape: f32[32,128], index: 1, kind: input, shape index: {}]   ;;  %s340_s2 = inlined_call_operand.vmem [shape: f32[1,128], index: 2, kind: input, shape index: {}]   ;;  %s341_s3 = inlined_call_operand.hbm [shape: f32[128,128], index: 3, kind: input, shape index: {}]   ;;  %s342_s4 = inlined_call_operand.vmem [shape: f32[1,128], index: 4, kind: input, shape index: {}]   ;;  %s343_s5 = inlined_call_operand.hbm [shape: f32[8,128], index: 5, kind: output, shape index: {}]  }
   0x1   :  { %11 = vsyncpa [#allocation6], 0  ;;  %s28_s20 = sshll.u32 %s339_s1, 4  ;;  %s29_s20 = int_to_ptr.hbm [resolvable:$true] %s28_s20 }
   0x2   :  { %12 = vsyncpa [#allocation4], 0  ;;  %s284_s21 = smov [#allocation5]   ;;  %s18_s25 = sshll.u32 %s338_s0, 4  ;;  %s19_s25 = int_to_ptr.hbm [resolvable:$true] %s18_s25 }
   0x3   :  { %s30_s22 = sshll.u32 %s284_s21, 4  ;;  %s285_s26 = smov 128   ;;  %s31_s22 = int_to_ptr.vmem [resolvable:$true] %s30_s22 }
   0x4   :  { %s286_s27 = smov 8   ;;  %s287_s28 = smov [#allocation2]  }
   0x5   :  { %36 = dma.hbm_to_vmem [thread:$0]  %s29_s20, 512, %s31_s22, [#allocation6], %s285_s26, %s285_s26, %s286_s27  }
   0x6   :  { %s20_s29 = sshll.u32 %s287_s28, 4  ;;  %s43_s7 = sshll.u32 %s341_s3, 4  ;;  %s21_s29 = int_to_ptr.vmem [resolvable:$true] %s20_s29  ;;  %s44_s7 = int_to_ptr.hbm [resolvable:$true] %s43_s7 }
   0x7   :  { %23 = dma.hbm_to_vmem [thread:$0]  %s19_s25, 128, %s21_s29, [#allocation3]  }
   0x8   :  { %s288_s1 = smov [#allocation7]  }
   0x9   :  { %s45_s8 = sshll.u32 %s288_s1, 4  ;;  %s46_s8 = int_to_ptr.vmem [resolvable:$true] %s45_s8 }
   0xa   :  { %51 = dma.hbm_to_vmem [thread:$0]  %s44_s7, 2048, %s46_s8, [#allocation6], %s285_s26, %s285_s26, %s286_s27  }
   0xb   :  { %278 = dma.done.wait [#allocation3], 128  }
   0xc   :  { %279 = vsyncadd [#allocation3], 4294967168 }
   0xd   :  { %280 = dma.done.wait [#allocation6], 2560  }
   0xe   :  { %281 = vsyncadd [#allocation6], 4294964736  ;;  %v70_v0 = vld [vmem:[#allocation5 + $0x18] sm:$0xff]  ;;  %v69_v1 = vld [vmem:[#allocation5 + $0x10] sm:$0xff]  ;;  %vm75_vm0 = vcmask 261120   ;;  %s158_s14 = sshll.u32 %s343_s5, 4  ;;  %s159_s14 = int_to_ptr.hbm [resolvable:$true] %s158_s14 }
   0xf   :  { %91 = vmatpush.msra.mxu0 %v70_v0  ;;  %v115_v2 = vld [vmem:[#allocation7 + $0x78] sm:$0xff]  ;;  %v68_v3 = vld [vmem:[#allocation5 + $0x8] sm:$0xff]  ;;  %v114_v4 = vld [vmem:[#allocation7 + $0x70] sm:$0xff] }
  0x10   :  { %120 = vmatpush.msra.mxu1 %v115_v2  ;;  %v113_v5 = vld [vmem:[#allocation7 + $0x68] sm:$0xff]  ;;  %v67_v6 = vld [vmem:[#allocation5] sm:$0xff]  ;;  %v66_v7 = vld [vmem:[#allocation2] sm:$0xff] }
  0x11   :  { %92 = vmatpush.msra.mxu0 %v69_v1  ;;  %v112_v8 = vld [vmem:[#allocation7 + $0x60] sm:$0xff]  ;;  %v111_v9 = vld [vmem:[#allocation7 + $0x58] sm:$0xff]  ;;  %v110_v10 = vld [vmem:[#allocation7 + $0x50] sm:$0xff] }
  0x12   :  { %121 = vmatpush.msra.mxu1 %v114_v4  ;;  %v109_v11 = vld [vmem:[#allocation7 + $0x48] sm:$0xff]  ;;  %v108_v12 = vld [vmem:[#allocation7 + $0x40] sm:$0xff]  ;;  %v107_v13 = vld [vmem:[#allocation7 + $0x38] sm:$0xff] }
  0x13   :  { %93 = vmatpush.msra.mxu0 %v68_v3  ;;  %v106_v14 = vld [vmem:[#allocation7 + $0x30] sm:$0xff]  ;;  %v105_v15 = vld [vmem:[#allocation7 + $0x28] sm:$0xff]  ;;  %v104_v16 = vld [vmem:[#allocation7 + $0x20] sm:$0xff] }
  0x14   :  { %122 = vmatpush.msra.mxu1 %v113_v5  ;;  %v103_v17 = vld [vmem:[#allocation7 + $0x18] sm:$0xff]  ;;  %v102_v18 = vld [vmem:[#allocation7 + $0x10] sm:$0xff]  ;;  %v101_v19 = vld [vmem:[#allocation7 + $0x8] sm:$0xff] }
  0x15   :  { %94 = vmatpush.msra.mxu0 %v67_v6  ;;  %v100_v20 = vld [vmem:[#allocation7] sm:$0xff]  ;;  %v176_v21 = vld [vmem:[%s340_s2] ss:$0 sm:$0xff]  ;;  %s289_s2 = smov [#allocation8]  }
  0x16   :  { %169 = vmatmul.msk.f32.vlgmr.msra.gmra.mxu0 %vm75_vm0, %v66_v7  ;;  %123 = vmatpush.msra.mxu1 %v112_v8  ;;  %v177_v25 = vld [vmem:[%s342_s4] ss:$0 sm:$0xff]  ;;  %s156_s11 = sshll.u32 %s289_s2, 4  ;;  %s157_s11 = int_to_ptr.vmem [resolvable:$true] %s156_s11 }
  0x18   :  { %124 = vmatpush.msra.mxu1 %v111_v9 }
  0x1a   :  { %125 = vmatpush.msra.mxu1 %v110_v10 }
  0x1c   :  { %126 = vmatpush.msra.mxu1 %v109_v11 }
  0x1e   :  { %127 = vmatpush.msra.mxu1 %v108_v12 }
  0x20   :  { %128 = vmatpush.msra.mxu1 %v107_v13 }
  0x22   :  { %129 = vmatpush.msra.mxu1 %v106_v14 }
  0x24   :  { %130 = vmatpush.msra.mxu1 %v105_v15 }
  0x26   :  { %131 = vmatpush.msra.mxu1 %v104_v16 }
  0x28   :  { %132 = vmatpush.msra.mxu1 %v103_v17 }
  0x2a   :  { %133 = vmatpush.msra.mxu1 %v102_v18 }
  0x2c   :  { %134 = vmatpush.msra.mxu1 %v101_v19 }
  0x2e   :  { %135 = vmatpush.msra.mxu1 %v100_v20 }
  0x93   :  { %v96_v22 = vpop.f32.mrf.mxu0 }
  0x94   :  { %v97_v23 = vadd.f32 %v176_v21, %v96_v22 }
  0x96   :  { %v99_v24 = vmax.f32 %v97_v23, 0.0 }
  0x98   :  { %136 = vmatmul.f32.vlgmr.msra.gmra.mxu1 %v99_v24 }
 0x115   :  { %v137_v26 = vpop.f32.mrf.mxu1 }
 0x116   :  { %v138_v27 = vadd.f32 %v177_v25, %v137_v26 }
 0x118   :  { %140 = vmax.xlane.f32.xlu0 %v138_v27 }
 0x18b   :  { %v141_v28 = vpop.xlane.xlu0 %140 }
 0x18c   :  { %v142_v29 = vsub.f32 %v138_v27, %v141_v28 }
 0x18e   :  { %v143_v30 = vmul.f32 1.442695, %v142_v29 }
 0x190   :  { %178 = vpow2.f32 %v143_v30 }
 0x196   :  { %v179_v31 = vpop.eup %178 }
 0x197   :  { %145 = vadd.xlane.f32.xlu0 %v179_v31 }
 0x20a   :  { %v146_v32 = vpop.xlane.xlu0 %145 }
 0x20b   :  { %180 = vlog2.f32 %v146_v32 }
 0x211   :  { %v181_v33 = vpop.eup %180 }
 0x212   :  { %v148_v34 = vmul.f32 0.6931472, %v181_v33 }
 0x214   :  { %v149_v35 = vsub.f32 %v142_v29, %v148_v34 }
 0x216   :  { %150 = vst [vmem:[#allocation8] sm:$0xff] %v149_v35 }
 0x217   :  { %161 = dma.vmem_to_hbm [thread:$0]  %s157_s11, 128, %s159_s14, [#allocation4]  }
 0x218   :  { %282 = dma.done.wait [#allocation4], 128  }
 0x219   :  { %283 = vsyncadd [#allocation4], 4294967168 }
 0x21a   :  { %166 = vsyncpa [#allocation3], 1 }
 0x21b   :  { %167 = vsyncpa [#allocation6], 1 }
 0x21c   :  { %168 = vsyncpa [#allocation4], 1 }

</bundles_post_ra>
